<compile_context>
chip_gen: v7x
topology: tpu7x:2x2x1
jax: 0.10.0
libtpu: 0.0.40
codegen_flags: <defaults>
</compile_context>

<pallas_src>
import functools

import jax
import jax.numpy as jnp
import numpy as np
from jax import lax
from jax.experimental import pallas as pl
from jax.experimental.pallas import tpu as pltpu

HIDDEN = 64
TILE_B = 1024          # max batch rows per grid step


def _round_up(v, m):
    return ((v + m - 1) // m) * m


# ----------------------------------------------------------------------------- kernel
def _mlp_kernel(x_ref, w1_ref, b1_ref, w2_ref, b2_ref, wh_ref, bh_ref, out_ref,
                *, atom_num):
    mm_dt = w1_ref.dtype
    # x arrives in its HBM dtype (f32); cast in-register right before the dot.
    x = x_ref[...].astype(mm_dt)
    h = jnp.tanh(jnp.dot(x, w1_ref[...],
                         preferred_element_type=jnp.float32) + b1_ref[...])
    h = jnp.tanh(jnp.dot(h.astype(mm_dt), w2_ref[...],
                         preferred_element_type=jnp.float32) + b2_ref[...])
    # Head weights already carry the folded dueling combine (q + s - mean_o q).
    y = jnp.dot(h.astype(mm_dt), wh_ref[...],
                preferred_element_type=jnp.float32) + bh_ref[...]

    if atom_num == 1:
        out_ref[...] = y
        return

    # Grouped log_softmax over contiguous, A-aligned groups of lanes
    # (lane k = o*A + a; softmax over a within each o).
    A = atom_num
    width = y.shape[-1]
    lane = lax.broadcasted_iota(jnp.int32, (1, width), 1)

    if (A & (A - 1)) == 0:
        # log2(A)-step XOR butterfly on the XLU (pltpu.roll).
        shifts = []
        s = 1
        while s < A:
            shifts.append(s)
            s *= 2
        # Direction/wrap-proof partner masks: read the actual source lane from
        # a rolled iota and compare with the desired XOR partner (lane ^ s).
        masks = []
        for s in shifts:
            src = pltpu.roll(lane, shift=s, axis=1)
            masks.append(src == (lane ^ s))

        def butterfly(v, op):
            for s, m in zip(shifts, masks):
                ra = pltpu.roll(v, shift=s, axis=1)
                rb = pltpu.roll(v, shift=width - s, axis=1)
                v = op(v, jnp.where(m, ra, rb))
            return v

        gmax = butterfly(y, jnp.maximum)          # per-group max, broadcast
        e = jnp.exp(y - gmax)                     # single EUP pass
        gsum = butterfly(e, jnp.add)              # per-group sum-exp, broadcast
    else:
        # TODO(synk): non-power-of-two atom_num uses a masked per-group loop
        # (exp still done once); not exercised by the RL configs.
        neg_big = jnp.float32(-1e30)
        ngroups = width // A
        gmasks = [(lane // A) == o for o in range(ngroups)]
        gmax = jnp.zeros_like(y)
        for o in range(ngroups):
            m = jnp.max(jnp.where(gmasks[o], y, neg_big), axis=-1, keepdims=True)
            gmax = gmax + jnp.where(gmasks[o], m, 0.0)
        e = jnp.exp(y - gmax)
        gsum = jnp.zeros_like(y)
        for o in range(ngroups):
            ssum = jnp.sum(jnp.where(gmasks[o], e, 0.0), axis=-1, keepdims=True)
            gsum = gsum + jnp.where(gmasks[o], ssum, 0.0)

    out_ref[...] = y - gmax - jnp.log(gsum)


# ----------------------------------------------------------------------------- wrapper
def _forward_impl(x, params, out_dim, atom_num, matmul_dtype, tile_b):
    B = x.shape[0]
    xf = x.reshape(B, -1)                 # no cast, no pad: single HBM read in-kernel
    in_dim = xf.shape[1]
    hidden = params["w1"].shape[1]
    O, A = out_dim, atom_num
    out_cols = O * A

    # Fold the dueling combine (q + s - mean_o q) into the head weights/bias:
    # it is linear in (q, s), which are affine in h.  Tiny f32 math, done once.
    wq3 = params["wq"].reshape(hidden, O, A)
    bq3 = params["bq"].reshape(1, O, A)
    wh = (wq3 - wq3.mean(axis=1, keepdims=True)
          + params["ws"][:, None, :]).reshape(hidden, out_cols)
    bh = (bq3 - bq3.mean(axis=1, keepdims=True)
          + params["bs"][:, None, :]).reshape(1, out_cols)

    w1 = params["w1"].astype(matmul_dtype)
    w2 = params["w2"].astype(matmul_dtype)
    wh = wh.astype(matmul_dtype)
    b1 = params["b1"].astype(jnp.float32)
    b2 = params["b2"].astype(jnp.float32)
    bh = bh.astype(jnp.float32)

    # Batch tiling: no padded copy.  Keep >= 2 grid steps whenever possible so
    # both v7x TensorCores get work; Pallas clips the ragged last block.
    if B <= 8:
        tb = B                                        # single full-extent block
    else:
        tb = min(tile_b, _round_up((B + 1) // 2, 8))  # multiple of 8, >= 2 steps
    grid_b = (B + tb - 1) // tb

    kernel = functools.partial(_mlp_kernel, atom_num=atom_num)

    w_bytes = (in_dim * hidden + hidden * hidden + hidden * out_cols) * \
        jnp.dtype(matmul_dtype).itemsize
    cost = pl.CostEstimate(
        flops=2 * B * (in_dim * hidden + hidden * hidden + hidden * out_cols),
        transcendentals=B * (2 * hidden + (2 * out_cols if atom_num > 1 else 0)),
        bytes_accessed=B * in_dim * xf.dtype.itemsize + B * out_cols * 4 + w_bytes,
    )

    # Weights use a constant index_map -> block index never changes, so Pallas
    # keeps them VMEM-resident and does not re-DMA them across grid steps.
    def resident(shape):
        nd = len(shape)
        return pl.BlockSpec(shape, lambda i, nd=nd: (0,) * nd)

    out = pl.pallas_call(
        kernel,
        out_shape=jax.ShapeDtypeStruct((B, out_cols), jnp.float32),
        grid=(grid_b,),
        in_specs=[
            pl.BlockSpec((tb, in_dim), lambda i: (i, 0)),   # x: batch-tiled
            resident((in_dim, hidden)),                     # w1
            resident((1, hidden)),                          # b1
            resident((hidden, hidden)),                     # w2
            resident((1, hidden)),                          # b2
            resident((hidden, out_cols)),                   # folded head weight
            resident((1, out_cols)),                        # folded head bias
        ],
        out_specs=pl.BlockSpec((tb, out_cols), lambda i: (i, 0)),
        compiler_params=pltpu.CompilerParams(
            dimension_semantics=("parallel",)),             # 2 TCs on v7x
        cost_estimate=cost,
    )(xf, w1, b1, w2, b2, wh, bh)

    if atom_num == 1:
        return out
    return out.reshape(B, out_dim, atom_num)


@functools.partial(jax.jit,
                   static_argnames=("out_dim", "atom_num", "matmul_dtype", "tile_b"))
def mlp_dueling_forward(x, params, *, out_dim, atom_num,
                        matmul_dtype=jnp.bfloat16, tile_b=TILE_B):
    return _forward_impl(x, params, out_dim, atom_num, matmul_dtype, tile_b)


# ----------------------------------------------------------------------------- params / reference
def _xavier_uniform(key, fan_in, fan_out):
    a = float(np.sqrt(6.0 / (fan_in + fan_out)))
    return jax.random.uniform(key, (fan_in, fan_out), jnp.float32, -a, a)


def make_params(key, in_dim, out_dim, atom_num):
    k1, k2, k3, k4 = jax.random.split(key, 4)
    return dict(
        w1=_xavier_uniform(k1, in_dim, HIDDEN), b1=jnp.zeros((1, HIDDEN), jnp.float32),
        w2=_xavier_uniform(k2, HIDDEN, HIDDEN), b2=jnp.zeros((1, HIDDEN), jnp.float32),
        wq=_xavier_uniform(k3, HIDDEN, out_dim * atom_num),
        bq=jnp.zeros((1, out_dim * atom_num), jnp.float32),
        ws=_xavier_uniform(k4, HIDDEN, atom_num),
        bs=jnp.zeros((1, atom_num), jnp.float32),
    )


def mlp_dueling_reference(x, p, out_dim, atom_num):
    B = x.shape[0]
    xf = x.reshape(B, -1).astype(jnp.float32)
    h = jnp.tanh(xf @ p["w1"] + p["b1"])
    h = jnp.tanh(h @ p["w2"] + p["b2"])
    q = h @ p["wq"] + p["bq"]
    s = h @ p["ws"] + p["bs"]
    if atom_num == 1:
        return s + q - q.mean(1, keepdims=True)
    q = q.reshape(B, out_dim, atom_num)
    q = s[:, None, :] + q - q.mean(1, keepdims=True)
    return jax.nn.log_softmax(q, -1)


# ----------------------------------------------------------------------------- main
if __name__ == "__main__":
    key = jax.random.PRNGKey(0)
    kx, kx2, kx3, kp1, kp2 = jax.random.split(key, 5)

    B, C, H, W = 2, 4, 16, 16
    in_dim = C * H * W            # 1024
    out_dim = 8
    atom_num = 4

    x_small = jax.random.normal(kx, (B, C, H, W), jnp.float32)
    params_a = make_params(kp1, in_dim, out_dim, atom_num)   # distributional head
    params_b = make_params(kp2, in_dim, out_dim, 1)          # scalar head

    # 1) f32-matmul semantics check, distributional dueling head (B=2, 1 block).
    out = jax.block_until_ready(mlp_dueling_forward(
        x_small, params_a, out_dim=out_dim, atom_num=atom_num,
        matmul_dtype=jnp.float32))
    ref = mlp_dueling_reference(x_small, params_a, out_dim, atom_num)
    np.testing.assert_allclose(np.asarray(out), np.asarray(ref), rtol=1e-4, atol=1e-4)

    # 2) f32-matmul semantics check, scalar dueling head.
    out = jax.block_until_ready(mlp_dueling_forward(
        x_small, params_b, out_dim=out_dim, atom_num=1, matmul_dtype=jnp.float32))
    ref = mlp_dueling_reference(x_small, params_b, out_dim, 1)
    np.testing.assert_allclose(np.asarray(out), np.asarray(ref), rtol=1e-4, atol=1e-4)

    # 3) ragged-grid path (B=50 -> tb=32, grid=(2,), clipped last block), f32.
    B_rag = 50
    x_rag = jax.random.normal(kx3, (B_rag, C, H, W), jnp.float32)
    out = jax.block_until_ready(mlp_dueling_forward(
        x_rag, params_a, out_dim=out_dim, atom_num=atom_num,
        matmul_dtype=jnp.float32))
    ref = mlp_dueling_reference(x_rag, params_a, out_dim, atom_num)
    np.testing.assert_allclose(np.asarray(out), np.asarray(ref), rtol=1e-4, atol=1e-4)

    # 4) batched + tiled path (B=400 -> tb=200, grid=(2,)) with the default
    #    bf16 matmul operands, compared against the f32 reference.
    B_big = 400
    x_big = jax.random.normal(kx2, (B_big, C, H, W), jnp.float32)

    out = jax.block_until_ready(mlp_dueling_forward(
        x_big, params_a, out_dim=out_dim, atom_num=atom_num))
    ref = mlp_dueling_reference(x_big, params_a, out_dim, atom_num)
    np.testing.assert_allclose(np.asarray(out), np.asarray(ref), rtol=5e-2, atol=5e-2)

    out = jax.block_until_ready(mlp_dueling_forward(
        x_big, params_b, out_dim=out_dim, atom_num=1))
    ref = mlp_dueling_reference(x_big, params_b, out_dim, 1)
    np.testing.assert_allclose(np.asarray(out), np.asarray(ref), rtol=5e-2, atol=5e-2)

    print("KERNEL_OK")
</pallas_src>

<mosaic_0001>
module attributes {stable_mosaic.version = 11 : i64} {
  func.func @_mlp_kernel(%arg0: i32, %arg1: memref<2x1024xf32, #tpu.memory_space<vmem>>, %arg2: memref<1024x64xf32, #tpu.memory_space<vmem>>, %arg3: memref<1x64xf32, #tpu.memory_space<vmem>>, %arg4: memref<64x64xf32, #tpu.memory_space<vmem>>, %arg5: memref<1x64xf32, #tpu.memory_space<vmem>>, %arg6: memref<64x32xf32, #tpu.memory_space<vmem>>, %arg7: memref<1x32xf32, #tpu.memory_space<vmem>>, %arg8: memref<2x32xf32, #tpu.memory_space<vmem>>) attributes {dimension_semantics = [#tpu.dimension_semantics<parallel>], iteration_bounds = array<i64: 1>, scalar_prefetch = 0 : i64, scratch_operands = 0 : i64, tpu.core_type = #tpu.core_type<tc>, window_params = [{transform_indices = @transform_0, window_bounds = array<i64: 2, 1024>}, {pipeline_mode = #tpu.pipeline_mode<synchronous>, transform_indices = @transform_1, window_bounds = array<i64: 1024, 64>}, {pipeline_mode = #tpu.pipeline_mode<synchronous>, transform_indices = @transform_2, window_bounds = array<i64: 1, 64>}, {pipeline_mode = #tpu.pipeline_mode<synchronous>, transform_indices = @transform_3, window_bounds = array<i64: 64, 64>}, {pipeline_mode = #tpu.pipeline_mode<synchronous>, transform_indices = @transform_4, window_bounds = array<i64: 1, 64>}, {pipeline_mode = #tpu.pipeline_mode<synchronous>, transform_indices = @transform_5, window_bounds = array<i64: 64, 32>}, {pipeline_mode = #tpu.pipeline_mode<synchronous>, transform_indices = @transform_6, window_bounds = array<i64: 1, 32>}, {transform_indices = @transform_7, window_bounds = array<i64: 2, 32>}]} {
    %c0 = arith.constant 0 : index
    %c0_0 = arith.constant 0 : index
    %0 = vector.load %arg1[%c0, %c0_0] : memref<2x1024xf32, #tpu.memory_space<vmem>>, vector<2x1024xf32>
    %c0_1 = arith.constant 0 : index
    %c0_2 = arith.constant 0 : index
    %1 = vector.load %arg2[%c0_1, %c0_2] : memref<1024x64xf32, #tpu.memory_space<vmem>>, vector<1024x64xf32>
    %cst = arith.constant dense<0.000000e+00> : vector<2x64xf32>
    %2 = tpu.matmul %0, %1, %cst {dimension_numbers = #tpu.dot_dimension_numbers<[1], [0], [0], [1], [0, 0, 1, 1], [], []>} : vector<2x1024xf32>, vector<1024x64xf32>, vector<2x64xf32> -> vector<2x64xf32>
    %c0_3 = arith.constant 0 : index
    %c0_4 = arith.constant 0 : index
    %3 = vector.load %arg3[%c0_3, %c0_4] : memref<1x64xf32, #tpu.memory_space<vmem>>, vector<1x64xf32>
    %4 = vector.broadcast %3 : vector<1x64xf32> to vector<2x64xf32>
    %5 = arith.addf %2, %4 : vector<2x64xf32>
    %6 = math.tanh %5 : vector<2x64xf32>
    %c0_5 = arith.constant 0 : index
    %c0_6 = arith.constant 0 : index
    %7 = vector.load %arg4[%c0_5, %c0_6] : memref<64x64xf32, #tpu.memory_space<vmem>>, vector<64x64xf32>
    %cst_7 = arith.constant dense<0.000000e+00> : vector<2x64xf32>
    %8 = tpu.matmul %6, %7, %cst_7 {dimension_numbers = #tpu.dot_dimension_numbers<[1], [0], [0], [1], [0, 0, 1, 1], [], []>} : vector<2x64xf32>, vector<64x64xf32>, vector<2x64xf32> -> vector<2x64xf32>
    %c0_8 = arith.constant 0 : index
    %c0_9 = arith.constant 0 : index
    %9 = vector.load %arg5[%c0_8, %c0_9] : memref<1x64xf32, #tpu.memory_space<vmem>>, vector<1x64xf32>
    %10 = vector.broadcast %9 : vector<1x64xf32> to vector<2x64xf32>
    %11 = arith.addf %8, %10 : vector<2x64xf32>
    %12 = math.tanh %11 : vector<2x64xf32>
    %c0_10 = arith.constant 0 : index
    %c0_11 = arith.constant 0 : index
    %13 = vector.load %arg6[%c0_10, %c0_11] : memref<64x32xf32, #tpu.memory_space<vmem>>, vector<64x32xf32>
    %cst_12 = arith.constant dense<0.000000e+00> : vector<2x32xf32>
    %14 = tpu.matmul %12, %13, %cst_12 {dimension_numbers = #tpu.dot_dimension_numbers<[1], [0], [0], [1], [0, 0, 1, 1], [], []>} : vector<2x64xf32>, vector<64x32xf32>, vector<2x32xf32> -> vector<2x32xf32>
    %c0_13 = arith.constant 0 : index
    %c0_14 = arith.constant 0 : index
    %15 = vector.load %arg7[%c0_13, %c0_14] : memref<1x32xf32, #tpu.memory_space<vmem>>, vector<1x32xf32>
    %16 = vector.broadcast %15 : vector<1x32xf32> to vector<2x32xf32>
    %17 = arith.addf %14, %16 : vector<2x32xf32>
    %18 = tpu.iota {dimensions = array<i32: 1>} : vector<1x32xi32>
    %c1_i32 = arith.constant 1 : i32
    %19 = tpu.dynamic_rotate %18 by %c1_i32 dim 1 : vector<1x32xi32>, i32 -> vector<1x32xi32>
    %c1_i32_15 = arith.constant 1 : i32
    %20 = vector.broadcast %c1_i32_15 : i32 to vector<1x32xi32>
    %21 = arith.xori %18, %20 : vector<1x32xi32>
    %22 = arith.cmpi eq, %19, %21 : vector<1x32xi32>
    %c2_i32 = arith.constant 2 : i32
    %23 = tpu.dynamic_rotate %18 by %c2_i32 dim 1 : vector<1x32xi32>, i32 -> vector<1x32xi32>
    %c2_i32_16 = arith.constant 2 : i32
    %24 = vector.broadcast %c2_i32_16 : i32 to vector<1x32xi32>
    %25 = arith.xori %18, %24 : vector<1x32xi32>
    %26 = arith.cmpi eq, %23, %25 : vector<1x32xi32>
    %c1_i32_17 = arith.constant 1 : i32
    %27 = tpu.dynamic_rotate %17 by %c1_i32_17 dim 1 : vector<2x32xf32>, i32 -> vector<2x32xf32>
    %c31_i32 = arith.constant 31 : i32
    %28 = tpu.dynamic_rotate %17 by %c31_i32 dim 1 : vector<2x32xf32>, i32 -> vector<2x32xf32>
    %29 = vector.shape_cast %22 : vector<1x32xi1> to vector<1x32xi1>
    %30 = vector.broadcast %29 : vector<1x32xi1> to vector<2x32xi1>
    %31 = arith.select %30, %27, %28 : vector<2x32xi1>, vector<2x32xf32>
    %32 = arith.maximumf %17, %31 : vector<2x32xf32>
    %c2_i32_18 = arith.constant 2 : i32
    %33 = tpu.dynamic_rotate %32 by %c2_i32_18 dim 1 : vector<2x32xf32>, i32 -> vector<2x32xf32>
    %c30_i32 = arith.constant 30 : i32
    %34 = tpu.dynamic_rotate %32 by %c30_i32 dim 1 : vector<2x32xf32>, i32 -> vector<2x32xf32>
    %35 = vector.shape_cast %26 : vector<1x32xi1> to vector<1x32xi1>
    %36 = vector.broadcast %35 : vector<1x32xi1> to vector<2x32xi1>
    %37 = arith.select %36, %33, %34 : vector<2x32xi1>, vector<2x32xf32>
    %38 = arith.maximumf %32, %37 : vector<2x32xf32>
    %39 = arith.subf %17, %38 : vector<2x32xf32>
    %40 = math.exp %39 : vector<2x32xf32>
    %c1_i32_19 = arith.constant 1 : i32
    %41 = tpu.dynamic_rotate %40 by %c1_i32_19 dim 1 : vector<2x32xf32>, i32 -> vector<2x32xf32>
    %c31_i32_20 = arith.constant 31 : i32
    %42 = tpu.dynamic_rotate %40 by %c31_i32_20 dim 1 : vector<2x32xf32>, i32 -> vector<2x32xf32>
    %43 = vector.shape_cast %22 : vector<1x32xi1> to vector<1x32xi1>
    %44 = vector.broadcast %43 : vector<1x32xi1> to vector<2x32xi1>
    %45 = arith.select %44, %41, %42 : vector<2x32xi1>, vector<2x32xf32>
    %46 = arith.addf %40, %45 : vector<2x32xf32>
    %c2_i32_21 = arith.constant 2 : i32
    %47 = tpu.dynamic_rotate %46 by %c2_i32_21 dim 1 : vector<2x32xf32>, i32 -> vector<2x32xf32>
    %c30_i32_22 = arith.constant 30 : i32
    %48 = tpu.dynamic_rotate %46 by %c30_i32_22 dim 1 : vector<2x32xf32>, i32 -> vector<2x32xf32>
    %49 = vector.shape_cast %26 : vector<1x32xi1> to vector<1x32xi1>
    %50 = vector.broadcast %49 : vector<1x32xi1> to vector<2x32xi1>
    %51 = arith.select %50, %47, %48 : vector<2x32xi1>, vector<2x32xf32>
    %52 = arith.addf %46, %51 : vector<2x32xf32>
    %53 = arith.subf %17, %38 : vector<2x32xf32>
    %54 = math.log %52 : vector<2x32xf32>
    %55 = arith.subf %53, %54 : vector<2x32xf32>
    %c0_23 = arith.constant 0 : index
    %c0_24 = arith.constant 0 : index
    %56 = vector.load %arg8[%c0_23, %c0_24] : memref<2x32xf32, #tpu.memory_space<vmem>>, vector<2x32xf32>
    tpu.vector_store %arg8[%c0_23, %c0_24], %55 {strides = array<i32>} : memref<2x32xf32, #tpu.memory_space<vmem>>, vector<2x32xf32>,
    return
  }
  func.func @transform_0(%arg0: i32) -> (i32, i32) {
    %c0_i32 = arith.constant 0 : i32
    %c0_i32_0 = arith.constant 0 : i32
    return %arg0, %c0_i32 : i32, i32
  }
  func.func @transform_1(%arg0: i32) -> (i32, i32) {
    %c0_i32 = arith.constant 0 : i32
    %c0_i32_0 = arith.constant 0 : i32
    %c0_i32_1 = arith.constant 0 : i32
    return %c0_i32, %c0_i32_0 : i32, i32
  }
  func.func @transform_2(%arg0: i32) -> (i32, i32) {
    %c0_i32 = arith.constant 0 : i32
    %c0_i32_0 = arith.constant 0 : i32
    %c0_i32_1 = arith.constant 0 : i32
    return %c0_i32, %c0_i32_0 : i32, i32
  }
  func.func @transform_3(%arg0: i32) -> (i32, i32) {
    %c0_i32 = arith.constant 0 : i32
    %c0_i32_0 = arith.constant 0 : i32
    %c0_i32_1 = arith.constant 0 : i32
    return %c0_i32, %c0_i32_0 : i32, i32
  }
  func.func @transform_4(%arg0: i32) -> (i32, i32) {
    %c0_i32 = arith.constant 0 : i32
    %c0_i32_0 = arith.constant 0 : i32
    %c0_i32_1 = arith.constant 0 : i32
    return %c0_i32, %c0_i32_0 : i32, i32
  }
  func.func @transform_5(%arg0: i32) -> (i32, i32) {
    %c0_i32 = arith.constant 0 : i32
    %c0_i32_0 = arith.constant 0 : i32
    %c0_i32_1 = arith.constant 0 : i32
    return %c0_i32, %c0_i32_0 : i32, i32
  }
  func.func @transform_6(%arg0: i32) -> (i32, i32) {
    %c0_i32 = arith.constant 0 : i32
    %c0_i32_0 = arith.constant 0 : i32
    %c0_i32_1 = arith.constant 0 : i32
    return %c0_i32, %c0_i32_0 : i32, i32
  }
  func.func @transform_7(%arg0: i32) -> (i32, i32) {
    %c0_i32 = arith.constant 0 : i32
    %c0_i32_0 = arith.constant 0 : i32
    return %arg0, %c0_i32 : i32, i32
  }
}

</mosaic_0001>

<bundles_post_ra>
// kernel: sub.1
= control target key start
LH: loop header
LB: loop body
LE: loop exit
PB: predicated region body
PF: predicated region fallthrough
CT: control target
= control target key end

     0   :  { %s100_s0 = inlined_call_operand.vmem [shape: f32[64,32], index: 0, kind: input, shape index: {}]   ;;  %s101_s1 = inlined_call_operand.vmem [shape: f32[64,32], index: 1, kind: input, shape index: {}]   ;;  %s102_s2 = inlined_call_operand.vmem [shape: f32[64,32], index: 2, kind: output, shape index: {}]  }
   0x1   :  { %v3_v0 = vld [vmem:[%s100_s0] sm:$0xff]  ;;  %v40_v2 = vld [vmem:[%s100_s0 + $0x8] sm:$0xff]  ;;  %v43_v5 = vld [vmem:[%s100_s0 + $0x10] sm:$0xff] }
   0x2   :  { %v4_v1 = vld [vmem:[%s101_s1] sm:$0xff]  ;;  %v41_v4 = vld [vmem:[%s101_s1 + $0x8] sm:$0xff]  ;;  %v44_v6 = vld [vmem:[%s101_s1 + $0x10] sm:$0xff] }
   0x3   :  { %v7_v3 = vsub.f32 %v3_v0, %v4_v1  ;;  %v16_v7 = vsub.f32 %v40_v2, %v41_v4  ;;  %v26_v8 = vsub.f32 %v43_v5, %v44_v6  ;;  %v46_v9 = vld [vmem:[%s100_s0 + $0x18] sm:$0xff] }
   0x4   :  { %v47_v10 = vld [vmem:[%s101_s1 + $0x18] sm:$0xff] }
   0x5   :  { %9 = vst [vmem:[%s102_s2] sm:$0xff] %v7_v3  ;;  %v36_v11 = vsub.f32 %v46_v9, %v47_v10  ;;  %42 = vst [vmem:[%s102_s2 + $0x8] sm:$0xff] %v16_v7 }
   0x6   :  { %45 = vst [vmem:[%s102_s2 + $0x10] sm:$0xff] %v26_v8 }
   0x7   :  { %48 = vst [vmem:[%s102_s2 + $0x18] sm:$0xff] %v36_v11 }

// kernel: mlp_dueling_forward.1
= control target key start
LH: loop header
LB: loop body
LE: loop exit
PB: predicated region body
PF: predicated region fallthrough
CT: control target
= control target key end

     0   :  { %v1145_v47 = vmov 1983009808   ;;  %v169_v49 = vlaneseq  ;;  %vm1147_vm0 = vmmov 0   ;;  %vm503_vm1 = vcmask 523264   ;;  %s1153_s12 = smov 97   ;;  %s1154_s13 = smov 28   ;;  %s1703_s1 = inlined_call_operand.vmem [shape: f32[1024,64], index: 1, kind: input, shape index: {}]   ;;  %s1704_s0 = inlined_call_operand.vmem [shape: f32[2,1024], index: 0, kind: input, shape index: {}]   ;;  %s1705_s3 = inlined_call_operand.vmem [shape: f32[64,64], index: 3, kind: input, shape index: {}]   ;;  %s1706_s5 = inlined_call_operand.vmem [shape: f32[64,32], index: 5, kind: input, shape index: {}]   ;;  %s1707_s2 = inlined_call_operand.vmem [shape: f32[1,64], index: 2, kind: input, shape index: {}]   ;;  %s1708_s4 = inlined_call_operand.vmem [shape: f32[1,64], index: 4, kind: input, shape index: {}]   ;;  %s1709_s6 = inlined_call_operand.vmem [shape: f32[1,32], index: 6, kind: input, shape index: {}]   ;;  %s1710_s7 = inlined_call_operand.vmem [shape: f32[2,32], index: 7, kind: output, shape index: {}]  }
   0x1   :  { %v44_v0 = vld [vmem:[%s1703_s1 + $0x80] sm:$0xff]  ;;  %v45_v1 = vld [vmem:[%s1703_s1 + $0x88] sm:$0xff]  ;;  %v46_v11 = vld [vmem:[%s1703_s1 + $0x90] sm:$0xff]  ;;  %v167_v48 = vunpack.c.l.s4 %v1145_v47  ;;  %vm668_vm2 = vcmask 1047808   ;;  %s1155_s14 = smov 98   ;;  %vm765_vm7 = vcmask 254976  }
   0x2   :  { %v28_v2 = vld [vmem:[%s1703_s1] sm:$0xff]  ;;  %v972_v3 = vpack.c.bf16 %v45_v1, %v44_v0  ;;  %v29_v4 = vld [vmem:[%s1703_s1 + $0x8] sm:$0xff]  ;;  %v47_v13 = vld [vmem:[%s1703_s1 + $0x98] sm:$0xff]  ;;  %v1323_v0 = vshrl.u32 %v169_v49, 7 }
   0x3   :  { %v76_v5 = vld [vmem:[%s1703_s1 + $0x180] sm:$0xff]  ;;  %v77_v6 = vld [vmem:[%s1703_s1 + $0x188] sm:$0xff]  ;;  %v974_v7 = vpack.c.bf16 %v29_v4, %v28_v2  ;;  %v30_v14 = vld [vmem:[%s1703_s1 + $0x10] sm:$0xff]  ;;  %v976_v16 = vpack.c.bf16 %v47_v13, %v46_v11  ;;  %v168_v63 = vunpack.c.0.s8 %v167_v48 }
   0x4   :  { %v1004_v8 = vpack.c.bf16 %v77_v6, %v76_v5  ;;  %v60_v9 = vld [vmem:[%s1703_s1 + $0x100] sm:$0xff]  ;;  %v61_v10 = vld [vmem:[%s1703_s1 + $0x108] sm:$0xff]  ;;  %973 = vmatprep.subr.bf16.mxu0 %v972_v3  ;;  %v31_v15 = vld [vmem:[%s1703_s1 + $0x18] sm:$0xff] }
   0x5   :  { %v1006_v12 = vpack.c.bf16 %v61_v10, %v60_v9  ;;  %975 = vmatpush3.bf16.msra.mxu0 %v974_v7  ;;  %v978_v17 = vpack.c.bf16 %v31_v15, %v30_v14  ;;  %v78_v18 = vld [vmem:[%s1703_s1 + $0x190] sm:$0xff]  ;;  %v79_v19 = vld [vmem:[%s1703_s1 + $0x198] sm:$0xff]  ;;  %v48_v23 = vld [vmem:[%s1703_s1 + $0xa0] sm:$0xff]  ;;  %v171_v13 = vsub.s32 %v168_v63, %v1323_v0 }
   0x6   :  { %1005 = vmatprep.subr.bf16.mxu1 %v1004_v8  ;;  %v62_v20 = vld [vmem:[%s1703_s1 + $0x110] sm:$0xff]  ;;  %v1008_v21 = vpack.c.bf16 %v79_v19, %v78_v18  ;;  %v63_v22 = vld [vmem:[%s1703_s1 + $0x118] sm:$0xff]  ;;  %v49_v24 = vld [vmem:[%s1703_s1 + $0xa8] sm:$0xff]  ;;  %977 = vmatprep.subr.bf16.mxu0 %v976_v16 }
   0x7   :  { %1007 = vmatpush3.bf16.msra.mxu1 %v1006_v12  ;;  %v1010_v25 = vpack.c.bf16 %v63_v22, %v62_v20  ;;  %v980_v26 = vpack.c.bf16 %v49_v24, %v48_v23  ;;  %v32_v27 = vld [vmem:[%s1703_s1 + $0x20] sm:$0xff]  ;;  %v33_v28 = vld [vmem:[%s1703_s1 + $0x28] sm:$0xff]  ;;  %v50_v35 = vld [vmem:[%s1703_s1 + $0xb0] sm:$0xff] }
   0x8   :  { %v80_v29 = vld [vmem:[%s1703_s1 + $0x1a0] sm:$0xff]  ;;  %1009 = vmatprep.subr.bf16.mxu1 %v1008_v21  ;;  %v81_v30 = vld [vmem:[%s1703_s1 + $0x1a8] sm:$0xff]  ;;  %v982_v33 = vpack.c.bf16 %v33_v28, %v32_v27  ;;  %v51_v36 = vld [vmem:[%s1703_s1 + $0xb8] sm:$0xff] }
   0x9   :  { %v64_v31 = vld [vmem:[%s1703_s1 + $0x120] sm:$0xff]  ;;  %v65_v32 = vld [vmem:[%s1703_s1 + $0x128] sm:$0xff]  ;;  %979 = vmatpush3.bf16.msra.mxu0 %v978_v17  ;;  %v1012_v34 = vpack.c.bf16 %v81_v30, %v80_v29  ;;  %v34_v37 = vld [vmem:[%s1703_s1 + $0x30] sm:$0xff]  ;;  %v984_v39 = vpack.c.bf16 %v51_v36, %v50_v35 }
   0xa   :  { %981 = vmatprep.subr.bf16.mxu0 %v980_v26  ;;  %v1014_v38 = vpack.c.bf16 %v65_v32, %v64_v31  ;;  %v35_v40 = vld [vmem:[%s1703_s1 + $0x38] sm:$0xff]  ;;  %v82_v41 = vld [vmem:[%s1703_s1 + $0x1b0] sm:$0xff]  ;;  %v52_v46 = vld [vmem:[%s1703_s1 + $0xc0] sm:$0xff] }
   0xb   :  { %1011 = vmatpush3.bf16.msra.mxu1 %v1010_v25  ;;  %v83_v42 = vld [vmem:[%s1703_s1 + $0x1b8] sm:$0xff]  ;;  %v66_v44 = vld [vmem:[%s1703_s1 + $0x130] sm:$0xff]  ;;  %v53_v50 = vld [vmem:[%s1703_s1 + $0xc8] sm:$0xff]  ;;  %v986_v51 = vpack.c.bf16 %v35_v40, %v34_v37 }
   0xc   :  { %1013 = vmatprep.subr.bf16.mxu1 %v1012_v34  ;;  %v1016_v43 = vpack.c.bf16 %v83_v42, %v82_v41  ;;  %v67_v45 = vld [vmem:[%s1703_s1 + $0x138] sm:$0xff]  ;;  %v84_v52 = vld [vmem:[%s1703_s1 + $0x1c0] sm:$0xff]  ;;  %v85_v53 = vld [vmem:[%s1703_s1 + $0x1c8] sm:$0xff]  ;;  %v988_v55 = vpack.c.bf16 %v53_v50, %v52_v46 }
   0xd   :  { %983 = vmatpush3.bf16.msra.mxu0 %v982_v33  ;;  %v1018_v54 = vpack.c.bf16 %v67_v45, %v66_v44  ;;  %v36_v56 = vld [vmem:[%s1703_s1 + $0x40] sm:$0xff]  ;;  %v37_v57 = vld [vmem:[%s1703_s1 + $0x48] sm:$0xff]  ;;  %v1020_v59 = vpack.c.bf16 %v85_v53, %v84_v52  ;;  %v54_v61 = vld [vmem:[%s1703_s1 + $0xd0] sm:$0xff] }
   0xe   :  { %985 = vmatprep.subr.bf16.mxu0 %v984_v39  ;;  %v68_v58 = vld [vmem:[%s1703_s1 + $0x140] sm:$0xff]  ;;  %v69_v60 = vld [vmem:[%s1703_s1 + $0x148] sm:$0xff]  ;;  %v55_v62 = vld [vmem:[%s1703_s1 + $0xd8] sm:$0xff]  ;;  %v990_v3 = vpack.c.bf16 %v37_v57, %v36_v56 }
   0xf   :  { %1015 = vmatpush3.bf16.msra.mxu1 %v1014_v38  ;;  %v86_v1 = vld [vmem:[%s1703_s1 + $0x1d0] sm:$0xff]  ;;  %v87_v2 = vld [vmem:[%s1703_s1 + $0x1d8] sm:$0xff]  ;;  %v1022_v4 = vpack.c.bf16 %v69_v60, %v68_v58  ;;  %v992_v5 = vpack.c.bf16 %v55_v62, %v54_v61  ;;  %v56_v11 = vld [vmem:[%s1703_s1 + $0xe0] sm:$0xff] }
  0x10   :  { %1017 = vmatprep.subr.bf16.mxu1 %v1016_v43  ;;  %v38_v6 = vld [vmem:[%s1703_s1 + $0x50] sm:$0xff]  ;;  %v39_v7 = vld [vmem:[%s1703_s1 + $0x58] sm:$0xff]  ;;  %v1024_v9 = vpack.c.bf16 %v87_v2, %v86_v1  ;;  %v57_v12 = vld [vmem:[%s1703_s1 + $0xe8] sm:$0xff] }
  0x11   :  { %987 = vmatpush3.bf16.msra.mxu0 %v986_v51  ;;  %v70_v8 = vld [vmem:[%s1703_s1 + $0x150] sm:$0xff]  ;;  %v71_v10 = vld [vmem:[%s1703_s1 + $0x158] sm:$0xff]  ;;  %v88_v14 = vld [vmem:[%s1703_s1 + $0x1e0] sm:$0xff]  ;;  %v994_v16 = vpack.c.bf16 %v39_v7, %v38_v6  ;;  %v996_v19 = vpack.c.bf16 %v57_v12, %v56_v11 }
  0x12   :  { %989 = vmatprep.subr.bf16.mxu0 %v988_v55  ;;  %v89_v15 = vld [vmem:[%s1703_s1 + $0x1e8] sm:$0xff]  ;;  %v40_v17 = vld [vmem:[%s1703_s1 + $0x60] sm:$0xff]  ;;  %v1026_v18 = vpack.c.bf16 %v71_v10, %v70_v8  ;;  %v58_v25 = vld [vmem:[%s1703_s1 + $0xf0] sm:$0xff] }
  0x13   :  { %1019 = vmatpush3.bf16.msra.mxu1 %v1018_v54  ;;  %v41_v20 = vld [vmem:[%s1703_s1 + $0x68] sm:$0xff]  ;;  %v72_v21 = vld [vmem:[%s1703_s1 + $0x160] sm:$0xff]  ;;  %v1028_v23 = vpack.c.bf16 %v89_v15, %v88_v14  ;;  %v59_v26 = vld [vmem:[%s1703_s1 + $0xf8] sm:$0xff] }
  0x14   :  { %1021 = vmatprep.subr.bf16.mxu1 %v1020_v59  ;;  %v26_v22 = vld [vmem:[%s1704_s0] sm:$0xff]  ;;  %v73_v24 = vld [vmem:[%s1703_s1 + $0x168] sm:$0xff]  ;;  %v90_v29 = vld [vmem:[%s1703_s1 + $0x1f0] sm:$0xff]  ;;  %v998_v31 = vpack.c.bf16 %v41_v20, %v40_v17  ;;  %v1000_v36 = vpack.c.bf16 %v59_v26, %v58_v25 }
  0x15   :  { %991 = vmatpush3.bf16.msra.mxu0 %v990_v3  ;;  %v172_v27 = vrot.slane %v26_v22, %v171_v13  ;;  %v165_v28 = vcombine.high %v26_v22, %v26_v22  ;;  %v91_v30 = vld [vmem:[%s1703_s1 + $0x1f8] sm:$0xff]  ;;  %v27_v32 = vld [vmem:[%s1704_s0 + $0x8] sm:$0xff]  ;;  %v1030_v35 = vpack.c.bf16 %v73_v24, %v72_v21  ;;  %v42_v37 = vld [vmem:[%s1703_s1 + $0x70] sm:$0xff] }
  0x16   :  { %993 = vmatprep.subr.bf16.mxu0 %v992_v5  ;;  %v43_v38 = vld [vmem:[%s1703_s1 + $0x78] sm:$0xff]  ;;  %v74_v39 = vld [vmem:[%s1703_s1 + $0x170] sm:$0xff]  ;;  %v1032_v40 = vpack.c.bf16 %v91_v30, %v90_v29  ;;  %v108_v42 = vld [vmem:[%s1703_s1 + $0x280] sm:$0xff]  ;;  %v182_v45 = vcombine.high %v27_v32, %v27_v32  ;;  %v1428_v59 = vrot.slane %v27_v32, %v171_v13 }
  0x17   :  { %1023 = vmatpush3.bf16.msra.mxu1 %v1022_v4  ;;  %v180_v33 = vcombine.high %v172_v27, %v172_v27  ;;  %v179_v34 = vrot.slane %v165_v28, %v171_v13  ;;  %v75_v41 = vld [vmem:[%s1703_s1 + $0x178] sm:$0xff]  ;;  %v109_v43 = vld [vmem:[%s1703_s1 + $0x288] sm:$0xff]  ;;  %v140_v46 = vld [vmem:[%s1703_s1 + $0x380] sm:$0xff]  ;;  %v1002_v48 = vpack.c.bf16 %v43_v38, %v42_v37 }
  0x18   :  { %1025 = vmatprep.subr.bf16.mxu1 %v1024_v9  ;;  %v141_v47 = vld [vmem:[%s1703_s1 + $0x388] sm:$0xff]  ;;  %v1034_v50 = vpack.c.bf16 %v75_v41, %v74_v39  ;;  %v1036_v51 = vpack.c.bf16 %v109_v43, %v108_v42  ;;  %v92_v52 = vld [vmem:[%s1703_s1 + $0x200] sm:$0xff]  ;;  %v110_v57 = vld [vmem:[%s1703_s1 + $0x290] sm:$0xff]  ;;  %v1436_v62 = vrot.slane %v182_v45, %v171_v13  ;;  %v197_v10 = vcombine.high %v1428_v59, %v1428_v59 }
  0x19   :  { %995 = vmatpush3.bf16.msra.mxu0 %v994_v16  ;;  %271 = vmatprep.mubr.f32.mxu0 %v180_v33  ;;  %v181_v44 = vcombine.high %v179_v34, %v179_v34  ;;  %v93_v53 = vld [vmem:[%s1703_s1 + $0x208] sm:$0xff]  ;;  %v124_v54 = vld [vmem:[%s1703_s1 + $0x300] sm:$0xff]  ;;  %v1068_v55 = vpack.c.bf16 %v141_v47, %v140_v46  ;;  %v111_v58 = vld [vmem:[%s1703_s1 + $0x298] sm:$0xff] }
  0x1a   :  { %997 = vmatprep.subr.bf16.mxu0 %v996_v19  ;;  %v125_v56 = vld [vmem:[%s1703_s1 + $0x308] sm:$0xff]  ;;  %v142_v60 = vld [vmem:[%s1703_s1 + $0x390] sm:$0xff]  ;;  %v143_v61 = vld [vmem:[%s1703_s1 + $0x398] sm:$0xff]  ;;  %v1038_v63 = vpack.c.bf16 %v93_v53, %v92_v52  ;;  %v1040_v2 = vpack.c.bf16 %v111_v58, %v110_v57  ;;  %v198_v13 = vcombine.high %v1436_v62, %v1436_v62 }
  0x1b   :  { %1027 = vmatpush3.bf16.msra.mxu1 %v1026_v18  ;;  %341 = vmatprep.mubr.f32.mxu1 %v181_v44  ;;  %v1070_v1 = vpack.c.bf16 %v125_v56, %v124_v54  ;;  %v94_v3 = vld [vmem:[%s1703_s1 + $0x210] sm:$0xff]  ;;  %v95_v4 = vld [vmem:[%s1703_s1 + $0x218] sm:$0xff]  ;;  %v1072_v6 = vpack.c.bf16 %v143_v61, %v142_v60  ;;  %v112_v8 = vld [vmem:[%s1703_s1 + $0x2a0] sm:$0xff] }
  0x1c   :  { %1029 = vmatprep.subr.bf16.mxu1 %v1028_v23  ;;  %v126_v5 = vld [vmem:[%s1703_s1 + $0x310] sm:$0xff]  ;;  %v127_v7 = vld [vmem:[%s1703_s1 + $0x318] sm:$0xff]  ;;  %v113_v9 = vld [vmem:[%s1703_s1 + $0x2a8] sm:$0xff]  ;;  %v1042_v14 = vpack.c.bf16 %v95_v4, %v94_v3 }
  0x1d   :  { %999 = vmatpush3.bf16.msra.mxu0 %v998_v31  ;;  %v144_v11 = vld [vmem:[%s1703_s1 + $0x3a0] sm:$0xff]  ;;  %v145_v12 = vld [vmem:[%s1703_s1 + $0x3a8] sm:$0xff]  ;;  %v1074_v15 = vpack.c.bf16 %v127_v7, %v126_v5  ;;  %v1044_v16 = vpack.c.bf16 %v113_v9, %v112_v8  ;;  %v114_v22 = vld [vmem:[%s1703_s1 + $0x2b0] sm:$0xff] }
  0x1e   :  { %1001 = vmatprep.subr.bf16.mxu0 %v1000_v36  ;;  %v96_v17 = vld [vmem:[%s1703_s1 + $0x220] sm:$0xff]  ;;  %v97_v18 = vld [vmem:[%s1703_s1 + $0x228] sm:$0xff]  ;;  %v1076_v20 = vpack.c.bf16 %v145_v12, %v144_v11  ;;  %v115_v23 = vld [vmem:[%s1703_s1 + $0x2b8] sm:$0xff] }
  0x1f   :  { %1031 = vmatpush3.bf16.msra.mxu1 %v1030_v35  ;;  %v128_v19 = vld [vmem:[%s1703_s1 + $0x320] sm:$0xff]  ;;  %v129_v21 = vld [vmem:[%s1703_s1 + $0x328] sm:$0xff]  ;;  %v146_v24 = vld [vmem:[%s1703_s1 + $0x3b0] sm:$0xff]  ;;  %v1046_v26 = vpack.c.bf16 %v97_v18, %v96_v17  ;;  %v1048_v28 = vpack.c.bf16 %v115_v23, %v114_v22 }
  0x20   :  { %1033 = vmatprep.subr.bf16.mxu1 %v1032_v40  ;;  %v147_v25 = vld [vmem:[%s1703_s1 + $0x3b8] sm:$0xff]  ;;  %v98_v29 = vld [vmem:[%s1703_s1 + $0x230] sm:$0xff]  ;;  %v117_v35 = vld [vmem:[%s1703_s1 + $0x2c8] sm:$0xff] }
  0x21   :  { %1003 = vmatpush3.bf16.msra.mxu0 %v1002_v48  ;;  %v99_v30 = vld [vmem:[%s1703_s1 + $0x238] sm:$0xff]  ;;  %v130_v31 = vld [vmem:[%s1703_s1 + $0x330] sm:$0xff]  ;;  %v1080_v32 = vpack.c.bf16 %v147_v25, %v146_v24  ;;  %v148_v36 = vld [vmem:[%s1703_s1 + $0x3c0] sm:$0xff] }
  0x22   :  { %1037 = vmatprep.subr.bf16.mxu0 %v1036_v51  ;;  %v131_v33 = vld [vmem:[%s1703_s1 + $0x338] sm:$0xff]  ;;  %v149_v37 = vld [vmem:[%s1703_s1 + $0x3c8] sm:$0xff]  ;;  %v1050_v38 = vpack.c.bf16 %v99_v30, %v98_v29  ;;  %v100_v41 = vld [vmem:[%s1703_s1 + $0x240] sm:$0xff] }
  0x23   :  { %1035 = vmatpush3.bf16.msra.mxu1 %v1034_v50  ;;  %v1082_v39 = vpack.c.bf16 %v131_v33, %v130_v31  ;;  %v101_v42 = vld [vmem:[%s1703_s1 + $0x248] sm:$0xff]  ;;  %v132_v43 = vld [vmem:[%s1703_s1 + $0x340] sm:$0xff]  ;;  %v1084_v44 = vpack.c.bf16 %v149_v37, %v148_v36  ;;  %v118_v46 = vld [vmem:[%s1703_s1 + $0x2d0] sm:$0xff] }
  0x24   :  { %1069 = vmatprep.subr.bf16.mxu1 %v1068_v55  ;;  %272 = vmatmul.mubr.f32.vlgmr.msra.gmra.mrb[0].mxu0 %v172_v27  ;;  %v1078_v27 = vpack.c.bf16 %v129_v21, %v128_v19  ;;  %v133_v45 = vld [vmem:[%s1703_s1 + $0x348] sm:$0xff]  ;;  %v119_v47 = vld [vmem:[%s1703_s1 + $0x2d8] sm:$0xff]  ;;  %v150_v48 = vld [vmem:[%s1703_s1 + $0x3d0] sm:$0xff]  ;;  %v1054_v51 = vpack.c.bf16 %v101_v42, %v100_v41 }
  0x25   :  { %1039 = vmatpush3.bf16.msra.mxu0 %v1038_v63  ;;  %411 = vmatprep.mubr.f32.mxu0 %v197_v10  ;;  %v151_v50 = vld [vmem:[%s1703_s1 + $0x3d8] sm:$0xff]  ;;  %v1086_v52 = vpack.c.bf16 %v133_v45, %v132_v43  ;;  %v1056_v53 = vpack.c.bf16 %v119_v47, %v118_v46  ;;  %v102_v54 = vld [vmem:[%s1703_s1 + $0x250] sm:$0xff]  ;;  %v120_v60 = vld [vmem:[%s1703_s1 + $0x2e0] sm:$0xff] }
  0x26   :  { %342 = vmatmul.mubr.f32.vlgmr.msra.gmra.mrb[0].mxu1 %v179_v34  ;;  %1041 = vmatprep.subr.bf16.mxu0 %v1040_v2  ;;  %v116_v34 = vld [vmem:[%s1703_s1 + $0x2c0] sm:$0xff]  ;;  %v103_v55 = vld [vmem:[%s1703_s1 + $0x258] sm:$0xff]  ;;  %v134_v56 = vld [vmem:[%s1703_s1 + $0x350] sm:$0xff]  ;;  %v1088_v57 = vpack.c.bf16 %v151_v50, %v150_v48 }
  0x27   :  { %1071 = vmatpush3.bf16.msra.mxu1 %v1070_v1  ;;  %481 = vmatprep.mubr.f32.mxu1 %v198_v13  ;;  %v1052_v40 = vpack.c.bf16 %v117_v35, %v116_v34  ;;  %v135_v58 = vld [vmem:[%s1703_s1 + $0x358] sm:$0xff]  ;;  %v121_v61 = vld [vmem:[%s1703_s1 + $0x2e8] sm:$0xff]  ;;  %v152_v63 = vld [vmem:[%s1703_s1 + $0x3e0] sm:$0xff]  ;;  %v1058_v2 = vpack.c.bf16 %v103_v55, %v102_v54  ;;  %v1148_v34 = vmov 0.0  }
  0x28   :  { %1073 = vmatprep.subr.bf16.mxu1 %v1072_v6  ;;  %v153_v1 = vld [vmem:[%s1703_s1 + $0x3e8] sm:$0xff]  ;;  %v1090_v3 = vpack.c.bf16 %v135_v58, %v134_v56  ;;  %v1060_v4 = vpack.c.bf16 %v121_v61, %v120_v60  ;;  %v104_v5 = vld [vmem:[%s1703_s1 + $0x260] sm:$0xff]  ;;  %v122_v10 = vld [vmem:[%s1703_s1 + $0x2f0] sm:$0xff] }
  0x29   :  { %1043 = vmatpush3.bf16.msra.mxu0 %v1042_v14  ;;  %v105_v6 = vld [vmem:[%s1703_s1 + $0x268] sm:$0xff]  ;;  %v136_v7 = vld [vmem:[%s1703_s1 + $0x360] sm:$0xff]  ;;  %v1092_v8 = vpack.c.bf16 %v153_v1, %v152_v63  ;;  %v123_v11 = vld [vmem:[%s1703_s1 + $0x2f8] sm:$0xff] }
  0x2a   :  { %1045 = vmatprep.subr.bf16.mxu0 %v1044_v16  ;;  %v137_v9 = vld [vmem:[%s1703_s1 + $0x368] sm:$0xff]  ;;  %v154_v12 = vld [vmem:[%s1703_s1 + $0x3f0] sm:$0xff]  ;;  %v155_v13 = vld [vmem:[%s1703_s1 + $0x3f8] sm:$0xff]  ;;  %v1062_v14 = vpack.c.bf16 %v105_v6, %v104_v5  ;;  %v1064_v16 = vpack.c.bf16 %v123_v11, %v122_v10 }
  0x2b   :  { %1075 = vmatpush3.bf16.msra.mxu1 %v1074_v15  ;;  %v1094_v15 = vpack.c.bf16 %v137_v9, %v136_v7  ;;  %v106_v17 = vld [vmem:[%s1703_s1 + $0x270] sm:$0xff]  ;;  %v107_v18 = vld [vmem:[%s1703_s1 + $0x278] sm:$0xff]  ;;  %v1096_v19 = vpack.c.bf16 %v155_v13, %v154_v12  ;;  %v488_v24 = vld [vmem:[%s1705_s3] sm:$0xff] }
  0x2c   :  { %1077 = vmatprep.subr.bf16.mxu1 %v1076_v20  ;;  %v138_v20 = vld [vmem:[%s1703_s1 + $0x370] sm:$0xff]  ;;  %v139_v21 = vld [vmem:[%s1703_s1 + $0x378] sm:$0xff]  ;;  %v1066_v22 = vpack.c.bf16 %v107_v18, %v106_v17  ;;  %v489_v25 = vld [vmem:[%s1705_s3 + $0x8] sm:$0xff] }
  0x2d   :  { %1047 = vmatpush3.bf16.msra.mxu0 %v1046_v26  ;;  %v1098_v23 = vpack.c.bf16 %v139_v21, %v138_v20  ;;  %v1101_v26 = vpack.c.bf16 %v489_v25, %v488_v24  ;;  %v492_v29 = vld [vmem:[%s1705_s3 + $0x20] sm:$0xff]  ;;  %v493_v30 = vld [vmem:[%s1705_s3 + $0x28] sm:$0xff]  ;;  %v495_v33 = vld [vmem:[%s1705_s3 + $0x38] sm:$0xff]  ;;  %v692_v25 = vsub.s32 0, %v1323_v0 }
  0x2e   :  { %1049 = vmatprep.subr.bf16.mxu0 %v1048_v28  ;;  %v1107_v31 = vpack.c.bf16 %v493_v30, %v492_v29  ;;  %v578_v36 = vld [vmem:[%s1706_s5] sm:$0xff]  ;;  %v579_v37 = vld [vmem:[%s1706_s5 + $0x8] sm:$0xff]  ;;  %v580_v58 = vld [vmem:[%s1706_s5 + $0x10] sm:$0xff] }
  0x2f   :  { %1079 = vmatpush3.bf16.msra.mxu1 %v1078_v27  ;;  %v1146_v27 = vmov 0.0|0.0   ;;  %v581_v60 = vld [vmem:[%s1706_s5 + $0x18] sm:$0xff]  ;;  %v582_v63 = vld [vmem:[%s1706_s5 + $0x20] sm:$0xff]  ;;  %v583_v1 = vld [vmem:[%s1706_s5 + $0x28] sm:$0xff] }
  0x30   :  { %1081 = vmatprep.subr.bf16.mxu1 %v1080_v32  ;;  %v494_v32 = vld [vmem:[%s1705_s3 + $0x30] sm:$0xff]  ;;  %v1116_v61 = vpack.c.bf16 %v581_v60, %v580_v58  ;;  %v772_v6 = vld [vmem:[%s1708_s4] ss:$0 sm:$0xff]  ;;  %s1150_s4 = smov 31  }
  0x31   :  { %1051 = vmatpush3.bf16.msra.mxu0 %v1050_v38  ;;  %v1110_v35 = vpack.c.bf16 %v495_v33, %v494_v32  ;;  %v1113_v38 = vpack.c.bf16 %v579_v37, %v578_v36  ;;  %v774_v11 = vld [vmem:[%s1709_s6] ss:$0 sm:$0xff]  ;;  %s1151_s6 = smov 30  }
  0x32   :  { %1053 = vmatprep.subr.bf16.mxu0 %v1052_v40  ;;  %v771_v40 = vld [vmem:[%s1707_s2] ss:$0 sm:$0xff] }
  0x33   :  { %1083 = vmatpush3.bf16.msra.mxu1 %v1082_v39 }
  0x34   :  { %1085 = vmatprep.subr.bf16.mxu1 %v1084_v44 }
  0x35   :  { %1055 = vmatpush3.bf16.msra.mxu0 %v1054_v51 }
  0x36   :  { %1057 = vmatprep.subr.bf16.mxu0 %v1056_v53 }
  0x37   :  { %1087 = vmatpush3.bf16.msra.mxu1 %v1086_v52 }
  0x38   :  { %1089 = vmatprep.subr.bf16.mxu1 %v1088_v57 }
  0x39   :  { %1059 = vmatpush3.bf16.msra.mxu0 %v1058_v2  ;;  %v1119_v2 = vpack.c.bf16 %v583_v1, %v582_v63 }
  0x3a   :  { %1061 = vmatprep.subr.bf16.mxu0 %v1060_v4  ;;  %v585_v4 = vld [vmem:[%s1706_s5 + $0x38] sm:$0xff] }
  0x3b   :  { %1091 = vmatpush3.bf16.msra.mxu1 %v1090_v3  ;;  %v584_v3 = vld [vmem:[%s1706_s5 + $0x30] sm:$0xff]  ;;  %s1149_s5 = smov 32  }
  0x3c   :  { %1093 = vmatprep.subr.bf16.mxu1 %v1092_v8  ;;  %v1122_v5 = vpack.c.bf16 %v585_v4, %v584_v3 }
  0x3d   :  { %1063 = vmatpush3.bf16.msra.mxu0 %v1062_v14 }
  0x3e   :  { %1065 = vmatprep.subr.bf16.mxu0 %v1064_v16 }
  0x3f   :  { %1095 = vmatpush3.bf16.msra.mxu1 %v1094_v15  ;;  %v667_v15 = vand.u32 127, %v169_v49 }
  0x40   :  { %1097 = vmatprep.subr.bf16.mxu1 %v1096_v19 }
  0x41   :  { %1067 = vmatpush3.bf16.msra.mxu0 %v1066_v22  ;;  %v675_v16 = vxor.u32 1, %v667_v15 }
  0x42   :  { %1100 = vmatprep.subr.bf16.mxu0 %v1146_v27 }
  0x43   :  { %1099 = vmatpush3.bf16.msra.mxu1 %v1098_v23 }
  0x44   :  { %412 = vmatmul.mubr.f32.vlgmr.msra.gmra.mrb[2].mxu0 %v1428_v59  ;;  %1112 = vmatprep.subr.bf16.mxu1 %v1146_v27  ;;  %v490_v59 = vld [vmem:[%s1705_s3 + $0x10] sm:$0xff] }
  0x45   :  { %1102 = vmatpush3.bf16.msra.mxu0 %v1101_v26  ;;  %950 = vmatprep.mubr.msk.f32.mxu0 %vm1147_vm0, %v1148_v34  ;;  %v1152_v26 = vmov 0  }
  0x46   :  { %482 = vmatmul.mubr.f32.vlgmr.msra.gmra.mrb[2].mxu1 %v1436_v62  ;;  %1103 = vmatprep.subr.bf16.mxu0 %v1146_v27  ;;  %v491_v62 = vld [vmem:[%s1705_s3 + $0x18] sm:$0xff] }
  0x47   :  { %v1104_v28 = vpack.c.bf16 %v491_v62, %v490_v59  ;;  %969 = vmatprep.mubr.msk.f32.mxu1 %vm1147_vm0, %v1148_v34  ;;  %1114 = vmatpush3.bf16.msra.mxu1 %v1113_v38 }
  0x48   :  { %1115 = vmatprep.subr.bf16.mxu1 %v1146_v27 }
  0x49   :  { %1105 = vmatpush3.bf16.msra.mxu0 %v1104_v28 }
  0x4a   :  { %1106 = vmatprep.subr.bf16.mxu0 %v1146_v27 }
  0x4b   :  { %1117 = vmatpush3.bf16.msra.mxu1 %v1116_v61 }
  0x4c   :  { %1118 = vmatprep.subr.bf16.mxu1 %v1146_v27 }
  0x4d   :  { %1108 = vmatpush3.bf16.msra.mxu0 %v1107_v31  ;;  %v679_v31 = vxor.u32 2, %v667_v15 }
  0x4e   :  { %1109 = vmatprep.subr.bf16.mxu0 %v1146_v27 }
  0x4f   :  { %1120 = vmatpush3.bf16.msra.mxu1 %v1119_v2 }
  0x50   :  { %1121 = vmatprep.subr.bf16.mxu1 %v1146_v27 }
  0x51   :  { %1111 = vmatpush3.bf16.msra.mxu0 %v1110_v35 }
  0x53   :  { %1123 = vmatpush3.bf16.msra.mxu1 %v1122_v5 }
  0xf7   :  { %v808_v39 = vpop.f32.mrb[0].mxu0 }
  0xf8   :  { %v809_v41 = vpop.f32.mrb[1].mxu0 }
  0xf9   :  { %v843_v42 = vpop.f32.mrb[0].mxu1  ;;  %v810_v43 = vadd.f32 %v809_v41, %v808_v39 }
  0xfa   :  { %v844_v44 = vpop.f32.mrb[1].mxu1 }
  0xfb   :  { %v845_v45 = vadd.f32 %v844_v44, %v843_v42  ;;  %v274_v46 = vadd.f32 %v810_v43, %v771_v40 }
  0xfd   :  { %v344_v47 = vadd.f32 %v845_v45, %v274_v46 }
 0x117   :  { %v878_v48 = vpop.f32.mrb[2].mxu0 }
 0x118   :  { %v879_v50 = vpop.f32.mrb[3].mxu0 }
 0x119   :  { %v913_v51 = vpop.f32.mrb[2].mxu1  ;;  %v880_v52 = vadd.f32 %v879_v50, %v878_v48 }
 0x11a   :  { %v914_v53 = vpop.f32.mrb[3].mxu1 }
 0x11b   :  { %v915_v54 = vadd.f32 %v914_v53, %v913_v51  ;;  %v414_v55 = vadd.f32 %v880_v52, %v344_v47 }
 0x11d   :  { %v484_v56 = vadd.f32 %v915_v54, %v414_v55 }
 0x11f   :  { %1137 = vtanh.f32 %v484_v56 }
 0x129   :  { %v1138_v57 = vpop.eup %1137 }
 0x12a   :  { %951 = vmatmul.mubr.msk.f32.vlgmr.msra.gmra.mrb[4].mxu0 %vm503_vm1, %v1138_v57 }
 0x1fd   :  { %v573_v7 = vpop.f32.mrb[4].mxu0 }
 0x1fe   :  { %v574_v8 = vadd.f32 %v772_v6, %v573_v7  ;;  %v952_v9 = vpop.f32.mrb[5].mxu0 }
 0x200   :  { %1139 = vtanh.f32 %v574_v8 }
 0x20a   :  { %v1140_v10 = vpop.eup %1139 }
 0x20b   :  { %970 = vmatmul.mubr.msk.f32.vlgmr.msra.gmra.mrb[4].mxu1 %vm503_vm1, %v1140_v10 }
 0x2de   :  { %v662_v12 = vpop.f32.mrb[4].mxu1 }
 0x2df   :  { %v663_v13 = vadd.f32 %v774_v11, %v662_v12  ;;  %v971_v14 = vpop.f32.mrb[5].mxu1 }
 0x2e1   :  { %683 = vrot.lane.b32.xlu0 %v663_v13, %s1149_s5 }
 0x2e5   :  { %669 = vrot.lane.b32.xlu0 %v667_v15, %s1149_s5 }
 0x2e9   :  { %676 = vrot.lane.b32.xlu0 %v675_v16, %s1150_s4 }
 0x353   :  { %v684_v17 = vpop.permute.xlu0 %683 }
 0x354   :  { %v685_v18 = vsel %vm668_vm2, %v684_v17, %v663_v13 }
 0x355   :  { %686 = vrot.lane.b32.xlu1 %v685_v18, %s1149_s5 }
 0x357   :  { %v670_v19 = vpop.permute.xlu0 %669 }
 0x358   :  { %v671_v20 = vsel %vm668_vm2, %v670_v19, %v667_v15 }
 0x359   :  { %672 = vrot.lane.b32.xlu1 %v671_v20, %s1149_s5 }
 0x35b   :  { %v677_v24 = vpop.permute.xlu0 %676 }
 0x3c7   :  { %v687_v21 = vpop.permute.xlu1 %686 }
 0x3c8   :  { %v688_v22 = vsel %vm668_vm2, %v687_v21, %v663_v13 }
 0x3c9   :  { %696 = vrot.lane.b32.xlu1 %v688_v22, %s1151_s6 }
 0x3cb   :  { %v673_v49 = vpop.permute.xlu1 %672 }
 0x3cc   :  { %v674_v23 = vsel %vm668_vm2, %v673_v49, %v667_v15 }
 0x3cd   :  { %vm678_vm3 = vcmp.eq.s32.totalorder %v674_v23, %v677_v24 }
 0x3ce   :  { %v689_v27 = vsel %vm678_vm3, 1, %v1152_v26 }
 0x3cf   :  { %v693_v59 = vrot.slane %v689_v27, %v692_v25 }
 0x3d1   :  { %vm694_vm4 = vcmp.eq.s32.totalorder %v693_v59, 1 }
 0x43b   :  { %v697_v62 = vpop.permute.xlu1 %696 }
 0x43c   :  { %v699_v28 = vsel %vm694_vm4, %v688_v22, %v697_v62 }
 0x43d   :  { %701 = vrot.lane.b32.xlu0 %v699_v28, %s1153_s12 }
 0x4af   :  { %v702_v29 = vpop.permute.xlu0 %701 }
 0x4b0   :  { %v704_v30 = vmax.f32 %v663_v13, %v702_v29 }
 0x4b2   :  { %705 = vrot.lane.b32.xlu1 %v704_v30, %s1149_s5 }
 0x4b6   :  { %680 = vrot.lane.b32.xlu1 %v679_v31, %s1151_s6 }
 0x524   :  { %v706_v32 = vpop.permute.xlu1 %705 }
 0x525   :  { %v707_v0 = vsel %vm668_vm2, %v706_v32, %v704_v30 }
 0x526   :  { %708 = vrot.lane.b32.xlu0 %v707_v0, %s1149_s5 }
 0x528   :  { %v681_v35 = vpop.permute.xlu1 %680 }
 0x529   :  { %vm682_vm5 = vcmp.eq.s32.totalorder %v674_v23, %v681_v35 }
 0x52a   :  { %v711_v36 = vsel %vm682_vm5, 1, %v1152_v26 }
 0x52b   :  { %v715_v37 = vrot.slane %v711_v36, %v692_v25 }
 0x52d   :  { %vm716_vm6 = vcmp.eq.s32.totalorder %v715_v37, 1 }
 0x598   :  { %v709_v33 = vpop.permute.xlu0 %708 }
 0x599   :  { %v710_v34 = vsel %vm668_vm2, %v709_v33, %v704_v30 }
 0x59a   :  { %718 = vrot.lane.b32.xlu0 %v710_v34, %s1154_s13 }
 0x60c   :  { %v719_v38 = vpop.permute.xlu0 %718 }
 0x60d   :  { %v721_v39 = vsel %vm716_vm6, %v710_v34, %v719_v38 }
 0x60e   :  { %723 = vrot.lane.b32.xlu1 %v721_v39, %s1155_s14 }
 0x680   :  { %v724_v40 = vpop.permute.xlu1 %723 }
 0x681   :  { %v726_v41 = vmax.f32 %v704_v30, %v724_v40 }
 0x683   :  { %v727_v42 = vsub.f32 %v663_v13, %v726_v41 }
 0x685   :  { %v728_v43 = vmul.f32 1.442695, %v727_v42 }
 0x687   :  { %1141 = vpow2.f32 %v728_v43 }
 0x691   :  { %v1142_v44 = vpop.eup %1141 }
 0x692   :  { %730 = vrot.lane.b32.xlu0 %v1142_v44, %s1149_s5 }
 0x704   :  { %v731_v45 = vpop.permute.xlu0 %730 }
 0x705   :  { %v732_v46 = vsel %vm668_vm2, %v731_v45, %v1142_v44 }
 0x706   :  { %733 = vrot.lane.b32.xlu1 %v732_v46, %s1149_s5 }
 0x778   :  { %v734_v47 = vpop.permute.xlu1 %733 }
 0x779   :  { %v735_v48 = vsel %vm668_vm2, %v734_v47, %v1142_v44 }
 0x77a   :  { %737 = vrot.lane.b32.xlu0 %v735_v48, %s1151_s6 }
 0x7ec   :  { %v738_v50 = vpop.permute.xlu0 %737 }
 0x7ed   :  { %v740_v51 = vsel %vm694_vm4, %v735_v48, %v738_v50 }
 0x7ee   :  { %742 = vrot.lane.b32.xlu1 %v740_v51, %s1153_s12 }
 0x860   :  { %v743_v52 = vpop.permute.xlu1 %742 }
 0x861   :  { %v745_v53 = vadd.f32 %v1142_v44, %v743_v52 }
 0x863   :  { %746 = vrot.lane.b32.xlu0 %v745_v53, %s1149_s5 }
 0x8d5   :  { %v747_v54 = vpop.permute.xlu0 %746 }
 0x8d6   :  { %v748_v55 = vsel %vm668_vm2, %v747_v54, %v745_v53 }
 0x8d7   :  { %749 = vrot.lane.b32.xlu1 %v748_v55, %s1149_s5 }
 0x949   :  { %v750_v56 = vpop.permute.xlu1 %749 }
 0x94a   :  { %v751_v57 = vsel %vm668_vm2, %v750_v56, %v745_v53 }
 0x94b   :  { %753 = vrot.lane.b32.xlu0 %v751_v57, %s1154_s13 }
 0x9bd   :  { %v754_v58 = vpop.permute.xlu0 %753 }
 0x9be   :  { %v756_v60 = vsel %vm716_vm6, %v751_v57, %v754_v58 }
 0x9bf   :  { %758 = vrot.lane.b32.xlu1 %v756_v60, %s1155_s14 }
 0xa31   :  { %v759_v61 = vpop.permute.xlu1 %758 }
 0xa32   :  { %v761_v63 = vadd.f32 %v759_v61, %v745_v53 }
 0xa34   :  { %1143 = vlog2.f32 %v761_v63 }
 0xa3e   :  { %v1144_v1 = vpop.eup %1143 }
 0xa3f   :  { %v763_v2 = vmul.f32 0.6931472, %v1144_v1 }
 0xa41   :  { %v764_v3 = vsub.f32 %v727_v42, %v763_v2 }
 0xa43   :  { %766 = vst.msk [vmem:[%s1710_s7] sm:$0x3] %vm765_vm7, %v764_v3 }

</bundles_post_ra>
